<compile_context>
chip_gen: v7x
topology: tpu7x:2x2x1
jax: 0.10.0
libtpu: 0.0.40
codegen_flags: <defaults>
</compile_context>

<pallas_src>
import functools

import jax
import jax.numpy as jnp
from jax.experimental import pallas as pl
from jax.experimental.pallas import tpu as pltpu

D_IN = 16                 # conv input depth
KD = 7                    # kernel depth
D_OUT = D_IN - KD + 1     # = 10 conv output depth positions
K = 7 * 7 * 7             # = 343 flattened receptive field
K_PAD = 384               # K padded to a multiple of 128
C_OUT = 23                # conv output channels
C_PAD = 32                # channels padded to a multiple of 8
N_CLASSES = 10


def _make_kernel(block_b):
    def fused_kernel(p_ref, wc_ref, w2_ref, out_ref, sigflat_ref):
        """Fused conv3d (one matmul) + sigmoid + linear (one matmul) + log_softmax.

        p_ref:       (D_OUT*block_b, K_PAD)  bf16   rows ordered d-major, b-minor
        wc_ref:      (K_PAD, C_PAD)          bf16   conv weight (padded)
        w2_ref:      (D_OUT*C_PAD, N)        f32    linear weight, row = d*C_PAD + c
        out_ref:     (block_b, N)            f32    log-probs
        sigflat_ref: (block_b, D_OUT*C_PAD)  f32    VMEM scratch
        """
        # Stage 1: the whole Conv3d as a single MXU matmul (bf16 in, f32 acc).
        conv = jnp.dot(p_ref[...], wc_ref[...],
                       preferred_element_type=jnp.float32)      # (D_OUT*BT, C_PAD)
        # Sigmoid once, in f32; divide goes to the EUP.
        sig = pl.reciprocal(1.0 + jnp.exp(-conv), approx=True)

        # Re-pack (d*BT + b, c) -> (b, d*C_PAD + c) with ten static column stores
        # (pure data movement; no serial accumulator, no per-d weight slices).
        for d in range(D_OUT):
            sigflat_ref[:, d * C_PAD:(d + 1) * C_PAD] = (
                sig[d * block_b:(d + 1) * block_b, :])

        # Stage 2: Linear(230 -> 10) as a single matmul (padded rows of w2 are zero).
        logits = jnp.dot(sigflat_ref[...], w2_ref[...],
                         preferred_element_type=jnp.float32)     # (BT, N)

        # LogSoftmax over classes.
        m = jnp.max(logits, axis=1, keepdims=True)
        s = logits - m
        out_ref[...] = s - jnp.log(jnp.sum(jnp.exp(s), axis=1, keepdims=True))

    return fused_kernel


def conv3d_then_linear(x, conv_w, lin_w, *, block_b=None):
    """x: (B, 1, 28, 28) f32 (784 elems/sample, as the module's view requires).
    conv_w: (23, 1, 7, 7, 7), lin_w: (10, 230)  -- PyTorch parameter layouts.
    Returns (B, 10) log-probs (f32)."""
    b = x.shape[0]
    if block_b is None:
        block_b = 128 if (b % 128 == 0) else b
    assert b % block_b == 0
    g = b // block_b

    # ---- wrapper-side data prep (plain JAX/XLA) ----
    xr = x.reshape(b, D_IN, 7 * 7).astype(jnp.float32)           # (B, 16, 49)
    # im2col along depth only: window d = rows d..d+6 flattened to K=343.
    windows = jnp.stack(
        [xr[:, d:d + KD, :].reshape(b, K) for d in range(D_OUT)], axis=1
    )                                                            # (B, D_OUT, K)
    windows = jnp.pad(windows, ((0, 0), (0, 0), (0, K_PAD - K)))  # pad K -> 384
    # Rows ordered (block, d, b_local) so each grid block is d-major internally.
    patches = (windows.reshape(g, block_b, D_OUT, K_PAD)
               .transpose(0, 2, 1, 3)
               .reshape(b * D_OUT, K_PAD)
               .astype(jnp.bfloat16))                            # (B*D_OUT, K_PAD)

    # Conv weight: (23,1,7,7,7) -> (K, 23) -> zero-pad to (K_PAD, C_PAD), bf16.
    wc = conv_w.reshape(C_OUT, K).T.astype(jnp.float32)
    wc = jnp.pad(wc, ((0, K_PAD - K), (0, C_PAD - C_OUT))).astype(jnp.bfloat16)

    # Linear weight: lin_w[j, c*10 + d] -> w2[d*C_PAD + c, j]; padded rows = 0.
    w2p = jnp.transpose(lin_w.reshape(N_CLASSES, C_OUT, D_OUT),
                        (2, 1, 0)).astype(jnp.float32)           # (D_OUT, C_OUT, N)
    w2p = jnp.pad(w2p, ((0, 0), (0, C_PAD - C_OUT), (0, 0)))     # (D_OUT, C_PAD, N)
    w2 = w2p.reshape(D_OUT * C_PAD, N_CLASSES)                   # (320, 10) f32

    bytes_accessed = (patches.size * 2 + wc.size * 2 + w2.size * 4
                      + b * N_CLASSES * 4)
    cost = pl.CostEstimate(
        flops=2 * b * D_OUT * K * C_OUT + 2 * b * (C_OUT * D_OUT) * N_CLASSES,
        transcendentals=b * D_OUT * C_OUT + b * N_CLASSES,
        bytes_accessed=bytes_accessed,
    )

    kernel = _make_kernel(block_b)
    return pl.pallas_call(
        kernel,
        out_shape=jax.ShapeDtypeStruct((b, N_CLASSES), jnp.float32),
        grid_spec=pltpu.PrefetchScalarGridSpec(
            num_scalar_prefetch=0,
            grid=(g,),
            in_specs=[
                pl.BlockSpec((D_OUT * block_b, K_PAD), lambda i: (i, 0)),
                pl.BlockSpec((K_PAD, C_PAD), lambda i: (0, 0)),
                pl.BlockSpec((D_OUT * C_PAD, N_CLASSES), lambda i: (0, 0)),
            ],
            out_specs=pl.BlockSpec((block_b, N_CLASSES), lambda i: (i, 0)),
            scratch_shapes=[pltpu.VMEM((block_b, D_OUT * C_PAD), jnp.float32)],
        ),
        compiler_params=pltpu.CompilerParams(
            dimension_semantics=("parallel",),
        ),
        cost_estimate=cost,
    )(patches, wc, w2)


def _reference(x, conv_w, lin_w):
    """Pure-JAX f32 reference mirroring the PyTorch forward exactly."""
    b = x.shape[0]
    xr = x.reshape(b, D_IN, 7, 7).astype(jnp.float32)
    wc = conv_w.reshape(C_OUT, K).astype(jnp.float32)
    conv = jnp.stack(
        [xr[:, d:d + KD].reshape(b, K) @ wc.T for d in range(D_OUT)], axis=2
    )                                                     # (B, C_OUT, D_OUT)
    sig = jax.nn.sigmoid(conv).reshape(b, C_OUT * D_OUT)  # channel-major flatten
    logits = sig @ lin_w.astype(jnp.float32).T
    return jax.nn.log_softmax(logits, axis=1)


if __name__ == "__main__":
    BATCH = 2
    key = jax.random.PRNGKey(0)
    kx, kc, kl = jax.random.split(key, 3)

    x = jax.random.normal(kx, (BATCH, 1, 28, 28), dtype=jnp.float32)
    conv_w = jax.random.normal(kc, (C_OUT, 1, KD, 7, 7), dtype=jnp.float32) * 0.05
    lin_w = jax.random.normal(kl, (N_CLASSES, C_OUT * D_OUT), dtype=jnp.float32) * 0.05

    out = jax.block_until_ready(conv3d_then_linear(x, conv_w, lin_w))
    ref = jax.block_until_ready(_reference(x, conv_w, lin_w))

    assert out.shape == (BATCH, N_CLASSES)
    max_err = float(jnp.max(jnp.abs(out - ref)))
    # bf16 matmul operands + approx reciprocal -> loosened tolerance vs f32 reference.
    assert max_err < 2e-2, (max_err, out, ref)
    print("KERNEL_OK")
</pallas_src>

<mosaic_0001>
module attributes {stable_mosaic.version = 11 : i64} {
  func.func @fused_kernel(%arg0: i32, %arg1: memref<20x384xbf16, #tpu.memory_space<vmem>>, %arg2: memref<384x32xbf16, #tpu.memory_space<vmem>>, %arg3: memref<320x10xf32, #tpu.memory_space<vmem>>, %arg4: memref<2x10xf32, #tpu.memory_space<vmem>>, %arg5: memref<2x320xf32, #tpu.memory_space<vmem>>) attributes {dimension_semantics = [#tpu.dimension_semantics<parallel>], iteration_bounds = array<i64: 1>, scalar_prefetch = 0 : i64, scratch_operands = 1 : i64, tpu.core_type = #tpu.core_type<tc>, window_params = [{transform_indices = @transform_0, window_bounds = array<i64: 20, 384>}, {pipeline_mode = #tpu.pipeline_mode<synchronous>, transform_indices = @transform_1, window_bounds = array<i64: 384, 32>}, {pipeline_mode = #tpu.pipeline_mode<synchronous>, transform_indices = @transform_2, window_bounds = array<i64: 320, 10>}, {transform_indices = @transform_3, window_bounds = array<i64: 2, 10>}]} {
    %c0 = arith.constant 0 : index
    %c0_0 = arith.constant 0 : index
    %0 = vector.load %arg1[%c0, %c0_0] : memref<20x384xbf16, #tpu.memory_space<vmem>>, vector<20x384xbf16>
    %c0_1 = arith.constant 0 : index
    %c0_2 = arith.constant 0 : index
    %1 = vector.load %arg2[%c0_1, %c0_2] : memref<384x32xbf16, #tpu.memory_space<vmem>>, vector<384x32xbf16>
    %cst = arith.constant dense<0.000000e+00> : vector<20x32xf32>
    %2 = tpu.matmul %0, %1, %cst {dimension_numbers = #tpu.dot_dimension_numbers<[1], [0], [0], [1], [0, 0, 1, 1], [], []>} : vector<20x384xbf16>, vector<384x32xbf16>, vector<20x32xf32> -> vector<20x32xf32>
    %cst_3 = arith.constant 0.000000e+00 : f32
    %3 = vector.broadcast %cst_3 : f32 to vector<20x32xf32>
    %4 = arith.subf %3, %2 : vector<20x32xf32>
    %5 = math.exp %4 : vector<20x32xf32>
    %cst_4 = arith.constant 1.000000e+00 : f32
    %6 = vector.broadcast %cst_4 : f32 to vector<20x32xf32>
    %7 = arith.addf %6, %5 : vector<20x32xf32>
    %8 = tpu.reciprocal %7 {approx = true} : vector<20x32xf32> -> vector<20x32xf32>
    %9 = vector.extract_strided_slice %8 {offsets = [0, 0], sizes = [2, 32], strides = [1, 1]} : vector<20x32xf32> to vector<2x32xf32>
    %c0_5 = arith.constant 0 : index
    %c0_6 = arith.constant 0 : index
    %10 = vector.load %arg5[%c0_5, %c0_6] : memref<2x320xf32, #tpu.memory_space<vmem>>, vector<2x32xf32>
    tpu.vector_store %arg5[%c0_5, %c0_6], %9 {strides = array<i32>} : memref<2x320xf32, #tpu.memory_space<vmem>>, vector<2x32xf32>,
    %11 = vector.extract_strided_slice %8 {offsets = [2, 0], sizes = [2, 32], strides = [1, 1]} : vector<20x32xf32> to vector<2x32xf32>
    %c0_7 = arith.constant 0 : index
    %c32 = arith.constant 32 : index
    %12 = vector.load %arg5[%c0_7, %c32] : memref<2x320xf32, #tpu.memory_space<vmem>>, vector<2x32xf32>
    tpu.vector_store %arg5[%c0_7, %c32], %11 {strides = array<i32>} : memref<2x320xf32, #tpu.memory_space<vmem>>, vector<2x32xf32>,
    %13 = vector.extract_strided_slice %8 {offsets = [4, 0], sizes = [2, 32], strides = [1, 1]} : vector<20x32xf32> to vector<2x32xf32>
    %c0_8 = arith.constant 0 : index
    %c64 = arith.constant 64 : index
    %14 = vector.load %arg5[%c0_8, %c64] : memref<2x320xf32, #tpu.memory_space<vmem>>, vector<2x32xf32>
    tpu.vector_store %arg5[%c0_8, %c64], %13 {strides = array<i32>} : memref<2x320xf32, #tpu.memory_space<vmem>>, vector<2x32xf32>,
    %15 = vector.extract_strided_slice %8 {offsets = [6, 0], sizes = [2, 32], strides = [1, 1]} : vector<20x32xf32> to vector<2x32xf32>
    %c0_9 = arith.constant 0 : index
    %c96 = arith.constant 96 : index
    %16 = vector.load %arg5[%c0_9, %c96] : memref<2x320xf32, #tpu.memory_space<vmem>>, vector<2x32xf32>
    tpu.vector_store %arg5[%c0_9, %c96], %15 {strides = array<i32>} : memref<2x320xf32, #tpu.memory_space<vmem>>, vector<2x32xf32>,
    %17 = vector.extract_strided_slice %8 {offsets = [8, 0], sizes = [2, 32], strides = [1, 1]} : vector<20x32xf32> to vector<2x32xf32>
    %c0_10 = arith.constant 0 : index
    %c128 = arith.constant 128 : index
    %18 = vector.load %arg5[%c0_10, %c128] : memref<2x320xf32, #tpu.memory_space<vmem>>, vector<2x32xf32>
    tpu.vector_store %arg5[%c0_10, %c128], %17 {strides = array<i32>} : memref<2x320xf32, #tpu.memory_space<vmem>>, vector<2x32xf32>,
    %19 = vector.extract_strided_slice %8 {offsets = [10, 0], sizes = [2, 32], strides = [1, 1]} : vector<20x32xf32> to vector<2x32xf32>
    %c0_11 = arith.constant 0 : index
    %c160 = arith.constant 160 : index
    %20 = vector.load %arg5[%c0_11, %c160] : memref<2x320xf32, #tpu.memory_space<vmem>>, vector<2x32xf32>
    tpu.vector_store %arg5[%c0_11, %c160], %19 {strides = array<i32>} : memref<2x320xf32, #tpu.memory_space<vmem>>, vector<2x32xf32>,
    %21 = vector.extract_strided_slice %8 {offsets = [12, 0], sizes = [2, 32], strides = [1, 1]} : vector<20x32xf32> to vector<2x32xf32>
    %c0_12 = arith.constant 0 : index
    %c192 = arith.constant 192 : index
    %22 = vector.load %arg5[%c0_12, %c192] : memref<2x320xf32, #tpu.memory_space<vmem>>, vector<2x32xf32>
    tpu.vector_store %arg5[%c0_12, %c192], %21 {strides = array<i32>} : memref<2x320xf32, #tpu.memory_space<vmem>>, vector<2x32xf32>,
    %23 = vector.extract_strided_slice %8 {offsets = [14, 0], sizes = [2, 32], strides = [1, 1]} : vector<20x32xf32> to vector<2x32xf32>
    %c0_13 = arith.constant 0 : index
    %c224 = arith.constant 224 : index
    %24 = vector.load %arg5[%c0_13, %c224] : memref<2x320xf32, #tpu.memory_space<vmem>>, vector<2x32xf32>
    tpu.vector_store %arg5[%c0_13, %c224], %23 {strides = array<i32>} : memref<2x320xf32, #tpu.memory_space<vmem>>, vector<2x32xf32>,
    %25 = vector.extract_strided_slice %8 {offsets = [16, 0], sizes = [2, 32], strides = [1, 1]} : vector<20x32xf32> to vector<2x32xf32>
    %c0_14 = arith.constant 0 : index
    %c256 = arith.constant 256 : index
    %26 = vector.load %arg5[%c0_14, %c256] : memref<2x320xf32, #tpu.memory_space<vmem>>, vector<2x32xf32>
    tpu.vector_store %arg5[%c0_14, %c256], %25 {strides = array<i32>} : memref<2x320xf32, #tpu.memory_space<vmem>>, vector<2x32xf32>,
    %27 = vector.extract_strided_slice %8 {offsets = [18, 0], sizes = [2, 32], strides = [1, 1]} : vector<20x32xf32> to vector<2x32xf32>
    %c0_15 = arith.constant 0 : index
    %c288 = arith.constant 288 : index
    %28 = vector.load %arg5[%c0_15, %c288] : memref<2x320xf32, #tpu.memory_space<vmem>>, vector<2x32xf32>
    tpu.vector_store %arg5[%c0_15, %c288], %27 {strides = array<i32>} : memref<2x320xf32, #tpu.memory_space<vmem>>, vector<2x32xf32>,
    %c0_16 = arith.constant 0 : index
    %c0_17 = arith.constant 0 : index
    %29 = vector.load %arg5[%c0_16, %c0_17] : memref<2x320xf32, #tpu.memory_space<vmem>>, vector<2x320xf32>
    %c0_18 = arith.constant 0 : index
    %c0_19 = arith.constant 0 : index
    %30 = vector.load %arg3[%c0_18, %c0_19] : memref<320x10xf32, #tpu.memory_space<vmem>>, vector<320x10xf32>
    %cst_20 = arith.constant dense<0.000000e+00> : vector<2x10xf32>
    %31 = tpu.matmul %29, %30, %cst_20 {dimension_numbers = #tpu.dot_dimension_numbers<[1], [0], [0], [1], [0, 0, 1, 1], [], []>} : vector<2x320xf32>, vector<320x10xf32>, vector<2x10xf32> -> vector<2x10xf32>
    %cst_21 = arith.constant dense<0xFF800000> : vector<2xf32>
    %32 = vector.multi_reduction <maximumf>, %31, %cst_21 [1] : vector<2x10xf32> to vector<2xf32>
    %33 = vector.shape_cast %32 : vector<2xf32> to vector<2x1xf32>
    %34 = vector.broadcast %33 : vector<2x1xf32> to vector<2x10xf32>
    %35 = arith.subf %31, %34 : vector<2x10xf32>
    %36 = math.exp %35 : vector<2x10xf32>
    %cst_22 = arith.constant dense<0.000000e+00> : vector<2xf32>
    %37 = vector.multi_reduction <add>, %36, %cst_22 [1] : vector<2x10xf32> to vector<2xf32>
    %38 = vector.shape_cast %37 : vector<2xf32> to vector<2x1xf32>
    %39 = math.log %38 : vector<2x1xf32>
    %40 = vector.broadcast %39 : vector<2x1xf32> to vector<2x10xf32>
    %41 = arith.subf %35, %40 : vector<2x10xf32>
    %c0_23 = arith.constant 0 : index
    %c0_24 = arith.constant 0 : index
    %42 = vector.load %arg4[%c0_23, %c0_24] : memref<2x10xf32, #tpu.memory_space<vmem>>, vector<2x10xf32>
    tpu.vector_store %arg4[%c0_23, %c0_24], %41 {strides = array<i32>} : memref<2x10xf32, #tpu.memory_space<vmem>>, vector<2x10xf32>,
    return
  }
  func.func @transform_0(%arg0: i32) -> (i32, i32) {
    %c0_i32 = arith.constant 0 : i32
    %c0_i32_0 = arith.constant 0 : i32
    return %arg0, %c0_i32 : i32, i32
  }
  func.func @transform_1(%arg0: i32) -> (i32, i32) {
    %c0_i32 = arith.constant 0 : i32
    %c0_i32_0 = arith.constant 0 : i32
    %c0_i32_1 = arith.constant 0 : i32
    return %c0_i32, %c0_i32_0 : i32, i32
  }
  func.func @transform_2(%arg0: i32) -> (i32, i32) {
    %c0_i32 = arith.constant 0 : i32
    %c0_i32_0 = arith.constant 0 : i32
    %c0_i32_1 = arith.constant 0 : i32
    return %c0_i32, %c0_i32_0 : i32, i32
  }
  func.func @transform_3(%arg0: i32) -> (i32, i32) {
    %c0_i32 = arith.constant 0 : i32
    %c0_i32_0 = arith.constant 0 : i32
    return %arg0, %c0_i32 : i32, i32
  }
}

</mosaic_0001>

<bundles_post_ra>
// kernel: tpu_custom_call.1
= control target key start
LH: loop header
LB: loop body
LE: loop exit
PB: predicated region body
PF: predicated region fallthrough
CT: control target
= control target key end

     0   :  { %s1211_s0 = inlined_call_operand.vmem [shape: bf16[20,384], index: 0, kind: input, shape index: {}]   ;;  %s1212_s1 = inlined_call_operand.vmem [shape: bf16[384,32], index: 1, kind: input, shape index: {}]   ;;  %s1213_s2 = inlined_call_operand.vmem [shape: f32[320,10], index: 2, kind: input, shape index: {}]   ;;  %s1214_s3 = inlined_call_operand.hbm [shape: f32[2,10], index: 3, kind: output, shape index: {}]  }
   0x1   :  { %v867_v0 = vld [vmem:[%s1212_s1 + $0x40] sm:$0xff]   ;;  %v870_v3 = vld [vmem:[%s1212_s1 + $0x48] sm:$0xff]   ;;  %v873_v6 = vld [vmem:[%s1212_s1 + $0x50] sm:$0xff]  }
   0x2   :  { %v868_v1 = vld [vmem:[%s1212_s1 + $0x80] sm:$0xff]   ;;  %694 = vmatprep.subr.bf16.mxu0 %v867_v0  ;;  %v871_v4 = vld [vmem:[%s1212_s1 + $0x88] sm:$0xff]   ;;  %v874_v7 = vld [vmem:[%s1212_s1 + $0x90] sm:$0xff]  }
   0x3   :  { %v869_v2 = vld [vmem:[%s1212_s1] sm:$0xff]   ;;  %776 = vmatprep.subr.bf16.mxu1 %v868_v1  ;;  %v872_v5 = vld [vmem:[%s1212_s1 + $0x8] sm:$0xff]   ;;  %v875_v8 = vld [vmem:[%s1212_s1 + $0x10] sm:$0xff]  }
   0x4   :  { %695 = vmatpush3.bf16.msra.mxu0 %v869_v2  ;;  %777 = vmatpush3.bf16.msra.mxu1 %v868_v1  ;;  %v876_v9 = vld [vmem:[%s1212_s1 + $0x58] sm:$0xff]   ;;  %v879_v12 = vld [vmem:[%s1212_s1 + $0x60] sm:$0xff]   ;;  %v882_v15 = vld [vmem:[%s1212_s1 + $0x68] sm:$0xff]  }
   0x5   :  { %696 = vmatprep.subr.bf16.mxu0 %v870_v3  ;;  %778 = vmatprep.subr.bf16.mxu1 %v871_v4  ;;  %v877_v10 = vld [vmem:[%s1212_s1 + $0x98] sm:$0xff]   ;;  %v880_v13 = vld [vmem:[%s1212_s1 + $0xa0] sm:$0xff]   ;;  %v883_v16 = vld [vmem:[%s1212_s1 + $0xa8] sm:$0xff]  }
   0x6   :  { %v878_v11 = vld [vmem:[%s1212_s1 + $0x18] sm:$0xff]   ;;  %v881_v14 = vld [vmem:[%s1212_s1 + $0x20] sm:$0xff]   ;;  %v884_v17 = vld [vmem:[%s1212_s1 + $0x28] sm:$0xff]  }
   0x7   :  { %v885_v18 = vld [vmem:[%s1212_s1 + $0x70] sm:$0xff]   ;;  %v888_v21 = vld [vmem:[%s1212_s1 + $0x78] sm:$0xff]  }
   0x8   :  { %697 = vmatpush3.bf16.msra.mxu0 %v872_v5  ;;  %779 = vmatpush3.bf16.msra.mxu1 %v871_v4  ;;  %v886_v19 = vld [vmem:[%s1212_s1 + $0xb0] sm:$0xff]   ;;  %v889_v22 = vld [vmem:[%s1212_s1 + $0xb8] sm:$0xff]  }
   0x9   :  { %698 = vmatprep.subr.bf16.mxu0 %v873_v6  ;;  %780 = vmatprep.subr.bf16.mxu1 %v874_v7  ;;  %v887_v20 = vld [vmem:[%s1212_s1 + $0x30] sm:$0xff]  }
   0xa   :  { %v893_v23 = vld [vmem:[%s1211_s0 + $0x4] ss:$12 sps:$4 sm:$0xff]   ;;  %v894_v24 = vld [vmem:[%s1211_s0 + $0x8] ss:$12 sps:$4 sm:$0xff]  }
   0xb   :  { %273 = vmatprep.mubr.bf16.mxu0 %v893_v23 }
   0xc   :  { %699 = vmatpush3.bf16.msra.mxu0 %v875_v8  ;;  %781 = vmatpush3.bf16.msra.mxu1 %v874_v7 }
   0xd   :  { %700 = vmatprep.subr.bf16.mxu0 %v876_v9  ;;  %782 = vmatprep.subr.bf16.mxu1 %v877_v10 }
  0x10   :  { %701 = vmatpush3.bf16.msra.mxu0 %v878_v11  ;;  %783 = vmatpush3.bf16.msra.mxu1 %v877_v10 }
  0x11   :  { %702 = vmatprep.subr.bf16.mxu0 %v879_v12  ;;  %784 = vmatprep.subr.bf16.mxu1 %v880_v13 }
  0x14   :  { %703 = vmatpush3.bf16.msra.mxu0 %v881_v14  ;;  %785 = vmatpush3.bf16.msra.mxu1 %v880_v13 }
  0x15   :  { %704 = vmatprep.subr.bf16.mxu0 %v882_v15  ;;  %786 = vmatprep.subr.bf16.mxu1 %v883_v16 }
  0x18   :  { %705 = vmatpush3.bf16.msra.mxu0 %v884_v17  ;;  %787 = vmatpush3.bf16.msra.mxu1 %v883_v16 }
  0x19   :  { %706 = vmatprep.subr.bf16.mxu0 %v885_v18  ;;  %788 = vmatprep.subr.bf16.mxu1 %v886_v19 }
  0x1a   :  { %8 = vsyncpa [#allocation4], 0  ;;  %v890_v25 = vld [vmem:[%s1212_s1 + $0x38] sm:$0xff]   ;;  %792 = vmatprep.mubr.bf16.mxu1 %v894_v24  ;;  %v891_v27 = vld [vmem:[%s1211_s0] ss:$12 sps:$4 sm:$0xff]   ;;  %v358_v8 = vlaneseq  ;;  %vm352_vm0 = vcmask 254976  }
  0x1b   :  { %v20_v26 = vld [vmem:[%s1211_s0 + $0x18] sm:$0x33]  ;;  %v895_v28 = vld [vmem:[%s1211_s0 + $0x20] ss:$0 sps:$4 sm:$0x33]   ;;  %v450_v32 = vld [vmem:[%s1213_s2 + $0x88] sm:$0xff] }
  0x1c   :  { %707 = vmatpush3.bf16.msra.mxu0 %v887_v20  ;;  %789 = vmatpush3.bf16.msra.mxu1 %v886_v19  ;;  %v667_v29 = vcombine.high %v20_v26, %v20_v26  ;;  %v666_v30 = vcombine.low %v20_v26, %v20_v26  ;;  %v449_v31 = vld [vmem:[%s1213_s2 + $0x80] sm:$0xff]  ;;  %v434_v35 = vld [vmem:[%s1213_s2 + $0x8] sm:$0xff]  ;;  %v451_v36 = vld [vmem:[%s1213_s2 + $0x90] sm:$0xff]  ;;  %v939_v6 = vmov 1983009808   ;;  %v359_v17 = vshrl.u32 %v358_v8, 7 }
  0x1d   :  { %708 = vmatprep.subr.bf16.mxu0 %v888_v21  ;;  %790 = vmatprep.subr.bf16.mxu1 %v889_v22  ;;  %v433_v33 = vld [vmem:[%s1213_s2] sm:$0xff]  ;;  %v815_v34 = vpack.c.bf16 %v450_v32, %v449_v31  ;;  %v452_v37 = vld [vmem:[%s1213_s2 + $0x98] sm:$0xff]  ;;  %v435_v40 = vld [vmem:[%s1213_s2 + $0x10] sm:$0xff]  ;;  %v356_v7 = vunpack.c.l.s4 %v939_v6  ;;  %s941_s19 = smov 64   ;;  %s942_s20 = smov 32   ;;  %vm943_vm1 = vmmov 0  }
  0x1e   :  { %v817_v38 = vpack.c.bf16 %v434_v35, %v433_v33  ;;  %v819_v39 = vpack.c.bf16 %v452_v37, %v451_v36  ;;  %v436_v41 = vld [vmem:[%s1213_s2 + $0x18] sm:$0xff]  ;;  %v453_v10 = vld [vmem:[%s1213_s2 + $0xa0] sm:$0xff]  ;;  %v454_v11 = vld [vmem:[%s1213_s2 + $0xa8] sm:$0xff]  ;;  %v940_v35 = vmov 0.0|0.0   ;;  %vm366_vm2 = vcmask 517376   ;;  %s946_s11 = smov [#allocation3]  }
  0x1f   :  { %v821_v42 = vpack.c.bf16 %v436_v41, %v435_v40  ;;  %v823_v12 = vpack.c.bf16 %v454_v11, %v453_v10  ;;  %v437_v13 = vld [vmem:[%s1213_s2 + $0x20] sm:$0xff]  ;;  %v438_v14 = vld [vmem:[%s1213_s2 + $0x28] sm:$0xff]  ;;  %v357_v16 = vunpack.c.0.s8 %v356_v7  ;;  %v455_v18 = vld [vmem:[%s1213_s2 + $0xb0] sm:$0xff]  ;;  %vm379_vm3 = vcmask 779776   ;;  %s655_s12 = sshll.u32 %s946_s11, 4  ;;  %s656_s12 = int_to_ptr.vmem [resolvable:$true] %s655_s12 }
  0x20   :  { %709 = vmatpush3.bf16.msra.mxu0 %v890_v25  ;;  %791 = vmatpush3.bf16.msra.mxu1 %v889_v22  ;;  %v825_v15 = vpack.c.bf16 %v438_v14, %v437_v13  ;;  %v456_v19 = vld [vmem:[%s1213_s2 + $0xb8] sm:$0xff]  ;;  %v439_v22 = vld [vmem:[%s1213_s2 + $0x30] sm:$0xff]  ;;  %v466_v31 = vld [vmem:[%s1213_s2 + $0x108] sm:$0xff]  ;;  %vm385_vm4 = vcmask 1042176   ;;  %vm492_vm5 = vcmask 523264   ;;  %vm635_vm6 = vcmask 74752   ;;  %p920_p1 = scmp.lt.s32.totalorder %s656_s12, %s656_s12 }
  0x21   :  { %816 = vmatprep.subr.bf16.mxu0 %v815_v34  ;;  %v827_v21 = vpack.c.bf16 %v456_v19, %v455_v18  ;;  %v440_v23 = vld [vmem:[%s1213_s2 + $0x38] sm:$0xff]  ;;  %v1102_v26 = vsub.s32 %v357_v16, %v359_v17  ;;  %v441_v32 = vld [vmem:[%s1213_s2 + $0x40] sm:$0xff]  ;;  %v442_v33 = vld [vmem:[%s1213_s2 + $0x48] sm:$0xff]  ;;  %847 = vmatprep.subr.bf16.mxu1 %v940_v35  ;;  %s915_s13 = scalar_lea.vmem %s656_s12, 32 }
  0x22   :  { %v829_v25 = vpack.c.bf16 %v440_v23, %v439_v22  ;;  %v833_v37 = vpack.c.bf16 %v442_v33, %v441_v32  ;;  %v459_v41 = vld [vmem:[%s1213_s2 + $0xd0] sm:$0xff]  ;;  %v448_v8 = vld [vmem:[%s1213_s2 + $0x78] sm:$0xff]  ;;  %p916_p0 = scmp.ne.s32.totalorder %s656_s12, %s915_s13  ;;  %p921_p2 = scmp.lt.s32.totalorder %s915_s13, %s915_s13 }
  0x23   :  { %274 = vmatmul.mubr.bf16.vlgmr.msra.gmra.mrb[0].mxu0 %v891_v27  ;;  %793 = vmatmul.mubr.bf16.vlgmr.msra.gmra.mrb[0].mxu1 %v895_v28  ;;  %v457_v27 = vld [vmem:[%s1213_s2 + $0xc0] sm:$0xff]  ;;  %v458_v28 = vld [vmem:[%s1213_s2 + $0xc8] sm:$0xff]  ;;  %v447_v7 = vld [vmem:[%s1213_s2 + $0x70] sm:$0xff] }
  0x24   :  { %281 = vmatprep.mubr.bf16.mxu0 %v667_v29  ;;  %818 = vmatpush3.bf16.msra.mxu0 %v817_v38  ;;  %v465_v29 = vld [vmem:[%s1213_s2 + $0x100] sm:$0xff]  ;;  %v845_v14 = vpack.c.bf16 %v448_v8, %v447_v7  ;;  %p922_p3 = por %p921_p2, %p920_p1 }
  0x25   :  { %820 = vmatprep.subr.bf16.mxu0 %v819_v39  ;;  %v848_v36 = vpack.c.bf16 %v466_v31, %v465_v29 }
  0x26   :  { %p923_p4 = pnand %p922_p3, %p916_p0 }
  0x27   :  { %849 = vmatpush3.bf16.msra.mxu1 %v848_v36 }
  0x28   :  { %822 = vmatpush3.bf16.msra.mxu0 %v821_v42  ;;  %v460_v42 = vld [vmem:[%s1213_s2 + $0xd8] sm:$0xff]  ;;  %850 = vmatprep.subr.bf16.mxu1 %v940_v35 }
  0x29   :  { %824 = vmatprep.subr.bf16.mxu0 %v823_v12 }
  0x2b   :  { %282 = vmatmul.mubr.bf16.gmra.mrb[4].mxu0 %v666_v30  ;;  %v831_v30 = vpack.c.bf16 %v458_v28, %v457_v27 }
  0x2c   :  { %826 = vmatpush3.bf16.msra.mxu0 %v825_v15 }
  0x2d   :  { %828 = vmatprep.subr.bf16.mxu0 %v827_v21 }
  0x30   :  { %830 = vmatpush3.bf16.msra.mxu0 %v829_v25 }
  0x31   :  { %832 = vmatprep.subr.bf16.mxu0 %v831_v30 }
  0x34   :  { %834 = vmatpush3.bf16.msra.mxu0 %v833_v37 }
  0xf6   :  { %v710_v43 = vpop.f32.mrb[0].mxu0  ;;  %v794_v44 = vpop.f32.mrb[0].mxu1 }
  0xf7   :  { %v711_v45 = vpop.f32.mrb[1].mxu0  ;;  %v323_v46 = vpop.f32.mrb[1].mxu1 }
  0xf8   :  { %v712_v47 = vadd.f32 %v711_v45, %v710_v43  ;;  %v713_v48 = vpop.f32.mrb[2].mxu0  ;;  %v795_v49 = vpop.f32.mrb[2].mxu1  ;;  %v467_v43 = vld [vmem:[%s1213_s2 + $0x110] sm:$0xff] }
  0xf9   :  { %v714_v50 = vpop.f32.mrb[3].mxu0  ;;  %v326_v51 = vpop.f32.mrb[3].mxu1  ;;  %v443_v49 = vld [vmem:[%s1213_s2 + $0x50] sm:$0xff] }
  0xfa   :  { %v324_v52 = vadd.f32 %v712_v47, %v323_v46  ;;  %v715_v53 = vadd.f32 %v714_v50, %v713_v48  ;;  %v468_v48 = vld [vmem:[%s1213_s2 + $0x118] sm:$0xff] }
  0xfb   :  { %v444_v50 = vld [vmem:[%s1213_s2 + $0x58] sm:$0xff] }
  0xfc   :  { %v337_v54 = vsub.f32 0.0, %v324_v52  ;;  %v327_v55 = vadd.f32 %v715_v53, %v326_v51  ;;  %v835_v51 = vpack.c.bf16 %v460_v42, %v459_v41  ;;  %v851_v52 = vpack.c.bf16 %v468_v48, %v467_v43 }
  0xfd   :  { %v837_v53 = vpack.c.bf16 %v444_v50, %v443_v49 }
  0xfe   :  { %v340_v56 = vmul.f32 1.442695, %v337_v54  ;;  %v338_v57 = vsub.f32 0.0, %v327_v55  ;;  %v716_v58 = vpop.f32.mrb[4].mxu0  ;;  %v461_v54 = vld [vmem:[%s1213_s2 + $0xe0] sm:$0xff]  ;;  %v462_v55 = vld [vmem:[%s1213_s2 + $0xe8] sm:$0xff]  ;;  %836 = vmatprep.subr.bf16.mxu0 %v835_v51  ;;  %852 = vmatpush3.bf16.msra.mxu1 %v851_v52 }
  0xff   :  { %v717_v59 = vpop.f32.mrb[5].mxu0  ;;  %838 = vmatpush3.bf16.msra.mxu0 %v837_v53  ;;  %853 = vmatprep.subr.bf16.mxu1 %v940_v35 }
 0x100   :  { %899 = vpow2.f32 %v340_v56  ;;  %v342_v60 = vmul.f32 1.442695, %v338_v57  ;;  %v718_v61 = vadd.f32 %v717_v59, %v716_v58  ;;  %v719_v62 = vpop.f32.mrb[6].mxu0  ;;  %v469_v56 = vld [vmem:[%s1213_s2 + $0x120] sm:$0xff]  ;;  %v470_v57 = vld [vmem:[%s1213_s2 + $0x128] sm:$0xff]  ;;  %v839_v59 = vpack.c.bf16 %v462_v55, %v461_v54 }
 0x101   :  { %v720_v63 = vpop.f32.mrb[7].mxu0  ;;  %v445_v58 = vld [vmem:[%s1213_s2 + $0x60] sm:$0xff]  ;;  %v463_v62 = vld [vmem:[%s1213_s2 + $0xf0] sm:$0xff] }
 0x102   :  { %901 = vpow2.f32 %v342_v60  ;;  %v332_v0 = vadd.f32 %v794_v44, %v718_v61  ;;  %v854_v60 = vpack.c.bf16 %v470_v57, %v469_v56  ;;  %v446_v61 = vld [vmem:[%s1213_s2 + $0x68] sm:$0xff]  ;;  %v464_v63 = vld [vmem:[%s1213_s2 + $0xf8] sm:$0xff]  ;;  %840 = vmatprep.subr.bf16.mxu0 %v839_v59 }
 0x103   :  { %v843_v6 = vpack.c.bf16 %v464_v63, %v463_v62 }
 0x104   :  { %v339_v1 = vsub.f32 0.0, %v332_v0  ;;  %855 = vmatpush3.bf16.msra.mxu1 %v854_v60 }
 0x105   :  { %856 = vmatprep.subr.bf16.mxu1 %v940_v35 }
 0x106   :  { %v344_v2 = vmul.f32 1.442695, %v339_v1 }
 0x108   :  { %903 = vpow2.f32 %v344_v2  ;;  %v841_v2 = vpack.c.bf16 %v446_v61, %v445_v58 }
 0x10a   :  { %v900_v3 = vpop.eup %899  ;;  %842 = vmatpush3.bf16.msra.mxu0 %v841_v2 }
 0x10b   :  { %v346_v4 = vadd.f32 1.0, %v900_v3  ;;  %v471_v3 = vld [vmem:[%s1213_s2 + $0x130] sm:$0xff]  ;;  %844 = vmatprep.subr.bf16.mxu0 %v843_v6 }
 0x10c   :  { %v902_v5 = vpop.eup %901 }
 0x10d   :  { %905 = vrcp.f32 %v346_v4  ;;  %v347_v9 = vadd.f32 1.0, %v902_v5  ;;  %v472_v4 = vld [vmem:[%s1213_s2 + $0x138] sm:$0xff]  ;;  %s945_s2 = smov 96  }
 0x10e   :  { %v857_v11 = vpack.c.bf16 %v472_v4, %v471_v3  ;;  %846 = vmatpush3.bf16.msra.mxu0 %v845_v14 }
 0x10f   :  { %907 = vrcp.f32 %v347_v9  ;;  %v944_v9 = vmov 0.0  }
 0x110   :  { %812 = vmatprep.mubr.msk.f32.mxu1 %vm943_vm1, %v944_v9  ;;  %858 = vmatpush3.bf16.msra.mxu1 %v857_v11 }
 0x112   :  { %v904_v20 = vpop.eup %903 }
 0x113   :  { %v348_v24 = vadd.f32 1.0, %v904_v20 }
 0x115   :  { %909 = vrcp.f32 %v348_v24 }
 0x117   :  { %v906_v34 = vpop.eup %905 }
 0x118   :  { %v368_v38 = vcombine.high %v906_v34, %v906_v34  ;;  %v361_v39 = vrot.slane %v906_v34, %v1102_v26  ;;  %353 = vst.msk [vmem:[#allocation2] sm:$0x3] %vm352_vm0, %v906_v34 }
 0x119   :  { %v908_v40 = vpop.eup %907 }
 0x11a   :  { %v375_v44 = vrot.slane %v368_v38, %v1102_v26  ;;  %v362_v45 = vcombine.high %v361_v39, %v361_v39  ;;  %v401_v46 = vcombine.high %v908_v40, %v908_v40  ;;  %v395_v47 = vrot.slane %v908_v40, %v1102_v26  ;;  %387 = vst.msk [vmem:[#allocation2 + $0x2] sm:$0x3] %vm352_vm0, %v908_v40 }
 0x11c   :  { %376 = vrot.lane.b32.xlu1 %v375_v44, %s941_s19  ;;  %363 = vrot.lane.b32.xlu0 %v362_v45, %s942_s20  ;;  %v408_v0 = vrot.slane %v401_v46, %v1102_v26  ;;  %v396_v1 = vcombine.high %v395_v47, %v395_v47  ;;  %v381_v10 = vcombine.high %v375_v44, %v375_v44 }
 0x11e   :  { %v413_v12 = vcombine.high %v408_v0, %v408_v0 }
 0x11f   :  { %v910_v5 = vpop.eup %909 }
 0x120   :  { %409 = vrot.lane.b32.xlu1 %v408_v0, %s941_s19  ;;  %397 = vrot.lane.b32.xlu0 %v396_v1, %s942_s20  ;;  %418 = vst.msk [vmem:[#allocation2 + $0x4] sm:$0x3] %vm352_vm0, %v910_v5  ;;  %v426_v13 = vrot.slane %v910_v5, %v1102_v26 }
 0x122   :  { %v427_v15 = vcombine.high %v426_v13, %v426_v13 }
 0x124   :  { %414 = vrot.lane.b32.xlu1 %v413_v12, %s945_s2  ;;  %382 = vrot.lane.b32.xlu0 %v381_v10, %s945_s2 }
 0x128   :  { %428 = vrot.lane.b32.xlu0 %v427_v15, %s942_s20 }
 0x18e   :  { %v377_v16 = vpop.permute.xlu1 %376  ;;  %v364_v17 = vpop.permute.xlu0 %363 }
 0x18f   :  { %367 = vst.msk [vmem:[#allocation2] sm:$0x3] %vm366_vm2, %v364_v17 }
 0x190   :  { %380 = vst.msk [vmem:[#allocation2] sm:$0x3] %vm379_vm3, %v377_v16 }
 0x192   :  { %v410_v18 = vpop.permute.xlu1 %409  ;;  %v398_v19 = vpop.permute.xlu0 %397 }
 0x193   :  { %400 = vst.msk [vmem:[#allocation2 + $0x2] sm:$0x3] %vm366_vm2, %v398_v19 }
 0x194   :  { %412 = vst.msk [vmem:[#allocation2 + $0x2] sm:$0x3] %vm379_vm3, %v410_v18 }
 0x196   :  { %v415_v20 = vpop.permute.xlu1 %414  ;;  %v383_v21 = vpop.permute.xlu0 %382 }
 0x197   :  { %417 = vst.msk [vmem:[#allocation2 + $0x2] sm:$0x3] %vm385_vm4, %v415_v20  ;;  %386 = vst.msk [vmem:[#allocation2] sm:$0x3] %vm385_vm4, %v383_v21 }
 0x19a   :  { %v429_v22 = vpop.permute.xlu0 %428 }
 0x19b   :  { %431 = vst.msk [vmem:[#allocation2 + $0x4] sm:$0x3] %vm366_vm2, %v429_v22 }
 0x1a2   :  { %v432_v23 = vld [vmem:[#allocation2] sm:$0x3f] }
 0x1a3   :  { %v474_v24 = vcombine.high %v432_v23, %v432_v23  ;;  %v481_v25 = vrot.slane %v432_v23, %v1102_v26 }
 0x1a5   :  { %v488_v27 = vrot.slane %v474_v24, %v1102_v26  ;;  %v489_v28 = vcombine.high %v481_v25, %v481_v25 }
 0x1a7   :  { %559 = vmatprep.mubr.f32.mxu0 %v489_v28  ;;  %813 = vmatmul.mubr.msk.f32.vlgmr.msra.gmra.mrb[4].mxu1 %vm492_vm5, %v488_v27 }
 0x1a8   :  { %560 = vmatmul.mubr.f32.vlgmr.msra.gmra.mrb[8].mxu0 %v481_v25 }
 0x27a   :  { %v631_v29 = vpop.f32.mrb[4].mxu1 }
 0x27b   :  { %v764_v30 = vpop.f32.mrb[8].mxu0  ;;  %v814_v31 = vpop.f32.mrb[5].mxu1 }
 0x27c   :  { %v765_v32 = vpop.f32.mrb[9].mxu0 }
 0x27d   :  { %v766_v33 = vadd.f32 %v765_v32, %v764_v30 }
 0x27f   :  { %v632_v34 = vadd.f32 %v766_v33, %v631_v29 }
 0x281   :  { %v636_v35 = vsel %vm635_vm6, %v632_v34, -inf }
 0x282   :  { %637 = vmax.xlane.f32.xlu1 %v636_v35 }
 0x30f   :  { %v638_v36 = vpop.xlane.xlu1 %637 }
 0x310   :  { %v639_v37 = vsub.f32 %v632_v34, %v638_v36 }
 0x312   :  { %v640_v38 = vmul.f32 1.442695, %v639_v37 }
 0x314   :  { %911 = vpow2.f32 %v640_v38 }
 0x31e   :  { %v912_v39 = vpop.eup %911 }
 0x31f   :  { %v642_v26 = vsel %vm635_vm6, %v912_v39, 0.0 }
 0x320   :  { %643 = vadd.xlane.f32.xlu0 %v642_v26 }
 0x3ad   :  { %v644_v40 = vpop.xlane.xlu0 %643 }
 0x3ae   :  { %913 = vlog2.f32 %v644_v40 }
 0x3b8   :  { %v914_v41 = vpop.eup %913 }
 0x3b9   :  { %v646_v42 = vmul.f32 0.6931472, %v914_v41 }
 0x3bb   :  { %v647_v43 = vsub.f32 %v639_v37, %v646_v42 }
 0x3bd   :  { %648 = vst.msk [vmem:[#allocation3] sm:$0x3] %vm635_vm6, %v647_v43 }
 0x3be   :  { %926 = shalt.err (!%p923_p4)
}
 0x3bf   :  { %s927_s1 = scalar_lea.hbm %s1214_s3, 32 }
 0x3c0   :  { %p928_p5 = scmp.ne.s32.totalorder %s1214_s3, %s927_s1  ;;  %p931_p6 = scmp.lt.u32.totalorder %s927_s1, %s1214_s3 }
 0x3c2   :  { %p933_p7 = pnand %p931_p6, %p928_p5 }
 0x3c4   :  { %936 = shalt.err (!%p933_p7)
}
 0x3c5   :  { %658 = dma.vmem_to_hbm [thread:$0]  %s656_s12, 32, %s1214_s3, [#allocation4]  }
 0x3c6   :  { %937 = dma.done.wait [#allocation4], 32  }
 0x3c7   :  { %938 = vsyncadd [#allocation4], 4294967264 }
 0x3c8   :  { %662 = vsyncpa [#allocation4], 1 }

</bundles_post_ra>
